<compile_context>
chip_gen: v5e
topology: v5e:2x2
jax: 0.10.0
libtpu: 0.0.40
codegen_flags: <defaults>
</compile_context>

<pallas_src>
import functools

import jax
import jax.numpy as jnp
import numpy as np
from jax.experimental import pallas as pl
from jax.experimental.pallas import tpu as pltpu


def _round_up(x, m):
    return (x + m - 1) // m * m


def _dwconv1d_kernel(x_ref, halo_ref, w_ref, b_ref, o_ref, *, K, TL):
    # x_ref    : (1, dim_in, TL)         current length tile
    # halo_ref : (1, 1, dim_in, K-1)     first K-1 input columns of the next tile
    # w_ref    : (K, dim_out, dim_in)    folded depthwise+pointwise weights
    # b_ref    : (dim_out, 1)            folded bias (f32)
    # o_ref    : (1, dim_out, TL)
    x_cur = x_ref[0]                                                 # (dim_in, TL)
    if K > 1:
        # (dim_in, TL + K - 1): the full input window this output tile needs.
        window = jnp.concatenate([x_cur, halo_ref[0, 0]], axis=-1)
    else:
        window = x_cur

    dim_out = w_ref.shape[1]
    acc = jnp.zeros((dim_out, TL), jnp.float32)
    for k in range(K):  # static unroll, K is small
        # MXU matmul per tap; the small lane-shifted slice is on the (dim_in, TL)
        # activation only (not the mult-times larger depthwise output).
        acc = acc + jnp.dot(w_ref[k], window[:, k:k + TL],
                            preferred_element_type=jnp.float32)
    acc = acc + b_ref[...]                                           # single folded bias
    o_ref[0] = acc.astype(o_ref.dtype)


def depthwise_conv1d(x, w_dw, b_dw, w_pw, b_pw, *, tile_l=512):
    """x: (B, dim_in, L) -> (B, dim_out, L - K + 1), dtype of x.

    w_dw: (dim_out, K)        depthwise weight (PyTorch (dim_out, 1, K) squeezed)
    b_dw: (dim_out, 1)        depthwise bias
    w_pw: (dim_out, dim_out)  1x1 conv weight (PyTorch (dim_out, dim_out, 1) squeezed)
    b_pw: (dim_out, 1)        1x1 conv bias
    """
    B, dim_in, L = x.shape
    dim_out, K = w_dw.shape
    assert dim_out % dim_in == 0, "groups=dim_in requires dim_out % dim_in == 0"
    mult = dim_out // dim_in
    L_out = L - K + 1
    assert L_out >= 1

    # ---- Fold depthwise + pointwise into K channel-mixing matrices (once, in f32) ----
    w_pw_f = w_pw.astype(jnp.float32).reshape(dim_out, dim_in, mult)   # [j, c, m]
    w_dw_f = w_dw.astype(jnp.float32).reshape(dim_in, mult, K)         # [c, m, k]
    w_eff = jnp.einsum('jcm,cmk->kjc', w_pw_f, w_dw_f).astype(w_pw.dtype)  # (K, dim_out, dim_in)
    bias_eff = (w_pw.astype(jnp.float32) @ b_dw.astype(jnp.float32)
                + b_pw.astype(jnp.float32))                            # (dim_out, 1), f32

    # ---- Length tiling: lane-dense blocks (multiple of 128) ----
    TL = min(tile_l, _round_up(L_out, 128))
    TL = _round_up(TL, 128)
    nL = pl.cdiv(L_out, TL)
    L_out_pad = nL * TL
    halo_w = max(K - 1, 1)
    L_in_pad = L_out_pad + halo_w
    x_pad = jnp.pad(x, ((0, 0), (0, 0), (0, L_in_pad - L)))

    # Thin halo side-array: first (K-1) input columns of the *next* tile, per tile.
    starts = (jnp.arange(nL) + 1) * TL
    idx = starts[:, None] + jnp.arange(halo_w)[None, :]                # (nL, halo_w)
    halo = jnp.moveaxis(jnp.take(x_pad, idx, axis=2), 2, 1)            # (B, nL, dim_in, halo_w)

    kernel = functools.partial(_dwconv1d_kernel, K=K, TL=TL)

    out_pad = pl.pallas_call(
        kernel,
        out_shape=jax.ShapeDtypeStruct((B, dim_out, L_out_pad), x.dtype),
        grid=(B, nL),
        in_specs=[
            pl.BlockSpec((1, dim_in, TL), lambda b, j: (b, 0, j)),         # x length tile
            pl.BlockSpec((1, 1, dim_in, halo_w), lambda b, j: (b, j, 0, 0)),  # halo columns
            pl.BlockSpec((K, dim_out, dim_in), lambda b, j: (0, 0, 0)),    # folded weights
            pl.BlockSpec((dim_out, 1), lambda b, j: (0, 0)),               # folded bias
        ],
        out_specs=pl.BlockSpec((1, dim_out, TL), lambda b, j: (b, 0, j)),
        compiler_params=pltpu.CompilerParams(
            dimension_semantics=("parallel", "parallel")),
    )(x_pad, halo, w_eff, bias_eff)

    return out_pad if L_out_pad == L_out else out_pad[:, :, :L_out]


def _reference(x, w_dw, b_dw, w_pw, b_pw):
    """Pure-JAX reference using lax.conv_general_dilated (matches nn.Conv1d)."""
    dim_in = x.shape[1]
    dw = jax.lax.conv_general_dilated(
        x, w_dw[:, None, :],                 # (O, I/groups=1, K)
        window_strides=(1,), padding="VALID",
        dimension_numbers=("NCH", "OIH", "NCH"),
        feature_group_count=dim_in)
    dw = dw + b_dw[None, :, :]
    pw = jax.lax.conv_general_dilated(
        dw, w_pw[:, :, None],                # (O, I, 1)
        window_strides=(1,), padding="VALID",
        dimension_numbers=("NCH", "OIH", "NCH"))
    return pw + b_pw[None, :, :]


if __name__ == "__main__":
    # Small synthetic configuration consistent with the module's forward.
    B, dim_in, dim_out, L, K = 2, 4, 8, 16, 3

    key = jax.random.PRNGKey(0)
    k1, k2, k3, k4, k5 = jax.random.split(key, 5)

    x = jax.random.normal(k1, (B, dim_in, L), dtype=jnp.float32)
    w_dw = jax.random.normal(k2, (dim_out, K), dtype=jnp.float32) * 0.1   # (dim_out, 1, K) squeezed
    b_dw = jax.random.normal(k3, (dim_out, 1), dtype=jnp.float32) * 0.1
    w_pw = jax.random.normal(k4, (dim_out, dim_out), dtype=jnp.float32) * 0.1  # (dim_out, dim_out, 1) squeezed
    b_pw = jax.random.normal(k5, (dim_out, 1), dtype=jnp.float32) * 0.1

    out = depthwise_conv1d(x, w_dw, b_dw, w_pw, b_pw)
    out = jax.block_until_ready(out)

    ref = jax.block_until_ready(_reference(x, w_dw, b_dw, w_pw, b_pw))
    np.testing.assert_allclose(np.asarray(out), np.asarray(ref), rtol=1e-5, atol=1e-5)

    print("KERNEL_OK")
</pallas_src>

<mosaic_0001>
module attributes {stable_mosaic.version = 11 : i64} {
  func.func @_dwconv1d_kernel(%arg0: i32, %arg1: i32, %arg2: memref<1x4x128xf32, #tpu.memory_space<vmem>>, %arg3: memref<1x1x4x2xf32, #tpu.memory_space<vmem>>, %arg4: memref<3x8x4xf32, #tpu.memory_space<vmem>>, %arg5: memref<8x1xf32, #tpu.memory_space<vmem>>, %arg6: memref<1x8x128xf32, #tpu.memory_space<vmem>>) attributes {dimension_semantics = [#tpu.dimension_semantics<parallel>, #tpu.dimension_semantics<parallel>], iteration_bounds = array<i64: 2, 1>, scalar_prefetch = 0 : i64, scratch_operands = 0 : i64, tpu.core_type = #tpu.core_type<tc>, window_params = [{transform_indices = @transform_0, window_bounds = array<i64: 1, 4, 128>}, {transform_indices = @transform_1, window_bounds = array<i64: 1, 1, 4, 2>}, {pipeline_mode = #tpu.pipeline_mode<synchronous>, transform_indices = @transform_2, window_bounds = array<i64: 3, 8, 4>}, {pipeline_mode = #tpu.pipeline_mode<synchronous>, transform_indices = @transform_3, window_bounds = array<i64: 8, 1>}, {transform_indices = @transform_4, window_bounds = array<i64: 1, 8, 128>}]} {
    %c0 = arith.constant 0 : index
    %c0_0 = arith.constant 0 : index
    %c0_1 = arith.constant 0 : index
    %0 = vector.load %arg2[%c0, %c0_0, %c0_1] : memref<1x4x128xf32, #tpu.memory_space<vmem>>, vector<1x4x128xf32>
    %1 = vector.shape_cast %0 : vector<1x4x128xf32> to vector<4x128xf32>
    %c0_2 = arith.constant 0 : index
    %c0_3 = arith.constant 0 : index
    %c0_4 = arith.constant 0 : index
    %c0_5 = arith.constant 0 : index
    %2 = vector.load %arg3[%c0_2, %c0_3, %c0_4, %c0_5] : memref<1x1x4x2xf32, #tpu.memory_space<vmem>>, vector<1x1x4x2xf32>
    %3 = vector.shape_cast %2 : vector<1x1x4x2xf32> to vector<4x2xf32>
    %4 = tpu.concatenate %1, %3 in 1 : vector<4x128xf32>, vector<4x2xf32> -> vector<4x130xf32>
    %cst = arith.constant 0.000000e+00 : f32
    %5 = vector.broadcast %cst : f32 to vector<8x128xf32>
    %c0_6 = arith.constant 0 : index
    %c0_7 = arith.constant 0 : index
    %c0_8 = arith.constant 0 : index
    %6 = vector.load %arg4[%c0_6, %c0_7, %c0_8] : memref<3x8x4xf32, #tpu.memory_space<vmem>>, vector<1x8x4xf32>
    %7 = vector.shape_cast %6 : vector<1x8x4xf32> to vector<8x4xf32>
    %8 = vector.extract_strided_slice %4 {offsets = [0, 0], sizes = [4, 128], strides = [1, 1]} : vector<4x130xf32> to vector<4x128xf32>
    %cst_9 = arith.constant dense<0.000000e+00> : vector<8x128xf32>
    %9 = tpu.matmul %7, %8, %cst_9 {dimension_numbers = #tpu.dot_dimension_numbers<[1], [0], [0], [1], [0, 0, 1, 1], [], []>} : vector<8x4xf32>, vector<4x128xf32>, vector<8x128xf32> -> vector<8x128xf32>
    %10 = arith.addf %5, %9 : vector<8x128xf32>
    %c1 = arith.constant 1 : index
    %c0_10 = arith.constant 0 : index
    %c0_11 = arith.constant 0 : index
    %11 = vector.load %arg4[%c1, %c0_10, %c0_11] : memref<3x8x4xf32, #tpu.memory_space<vmem>>, vector<1x8x4xf32>
    %12 = vector.shape_cast %11 : vector<1x8x4xf32> to vector<8x4xf32>
    %13 = vector.extract_strided_slice %4 {offsets = [0, 1], sizes = [4, 128], strides = [1, 1]} : vector<4x130xf32> to vector<4x128xf32>
    %cst_12 = arith.constant dense<0.000000e+00> : vector<8x128xf32>
    %14 = tpu.matmul %12, %13, %cst_12 {dimension_numbers = #tpu.dot_dimension_numbers<[1], [0], [0], [1], [0, 0, 1, 1], [], []>} : vector<8x4xf32>, vector<4x128xf32>, vector<8x128xf32> -> vector<8x128xf32>
    %15 = arith.addf %10, %14 : vector<8x128xf32>
    %c2 = arith.constant 2 : index
    %c0_13 = arith.constant 0 : index
    %c0_14 = arith.constant 0 : index
    %16 = vector.load %arg4[%c2, %c0_13, %c0_14] : memref<3x8x4xf32, #tpu.memory_space<vmem>>, vector<1x8x4xf32>
    %17 = vector.shape_cast %16 : vector<1x8x4xf32> to vector<8x4xf32>
    %18 = vector.extract_strided_slice %4 {offsets = [0, 2], sizes = [4, 128], strides = [1, 1]} : vector<4x130xf32> to vector<4x128xf32>
    %cst_15 = arith.constant dense<0.000000e+00> : vector<8x128xf32>
    %19 = tpu.matmul %17, %18, %cst_15 {dimension_numbers = #tpu.dot_dimension_numbers<[1], [0], [0], [1], [0, 0, 1, 1], [], []>} : vector<8x4xf32>, vector<4x128xf32>, vector<8x128xf32> -> vector<8x128xf32>
    %20 = arith.addf %15, %19 : vector<8x128xf32>
    %c0_16 = arith.constant 0 : index
    %c0_17 = arith.constant 0 : index
    %21 = vector.load %arg5[%c0_16, %c0_17] : memref<8x1xf32, #tpu.memory_space<vmem>>, vector<8x1xf32>
    %22 = vector.broadcast %21 : vector<8x1xf32> to vector<8x128xf32>
    %23 = arith.addf %20, %22 : vector<8x128xf32>
    %c0_18 = arith.constant 0 : index
    %c0_19 = arith.constant 0 : index
    %c0_20 = arith.constant 0 : index
    %24 = vector.load %arg6[%c0_18, %c0_19, %c0_20] : memref<1x8x128xf32, #tpu.memory_space<vmem>>, vector<1x8x128xf32>
    %25 = vector.shape_cast %24 : vector<1x8x128xf32> to vector<8x128xf32>
    %26 = vector.shape_cast %23 : vector<8x128xf32> to vector<1x8x128xf32>
    tpu.vector_store %arg6[%c0_18, %c0_19, %c0_20], %26 {strides = array<i32>} : memref<1x8x128xf32, #tpu.memory_space<vmem>>, vector<1x8x128xf32>,
    return
  }
  func.func @transform_0(%arg0: i32, %arg1: i32) -> (i32, i32, i32) {
    %c0_i32 = arith.constant 0 : i32
    %c0_i32_0 = arith.constant 0 : i32
    return %arg0, %c0_i32, %arg1 : i32, i32, i32
  }
  func.func @transform_1(%arg0: i32, %arg1: i32) -> (i32, i32, i32, i32) {
    %c0_i32 = arith.constant 0 : i32
    %c0_i32_0 = arith.constant 0 : i32
    %c0_i32_1 = arith.constant 0 : i32
    return %arg0, %arg1, %c0_i32, %c0_i32_0 : i32, i32, i32, i32
  }
  func.func @transform_2(%arg0: i32, %arg1: i32) -> (i32, i32, i32) {
    %c0_i32 = arith.constant 0 : i32
    %c0_i32_0 = arith.constant 0 : i32
    %c0_i32_1 = arith.constant 0 : i32
    %c0_i32_2 = arith.constant 0 : i32
    return %c0_i32, %c0_i32_0, %c0_i32_1 : i32, i32, i32
  }
  func.func @transform_3(%arg0: i32, %arg1: i32) -> (i32, i32) {
    %c0_i32 = arith.constant 0 : i32
    %c0_i32_0 = arith.constant 0 : i32
    %c0_i32_1 = arith.constant 0 : i32
    return %c0_i32, %c0_i32_0 : i32, i32
  }
  func.func @transform_4(%arg0: i32, %arg1: i32) -> (i32, i32, i32) {
    %c0_i32 = arith.constant 0 : i32
    %c0_i32_0 = arith.constant 0 : i32
    return %arg0, %c0_i32, %arg1 : i32, i32, i32
  }
}

</mosaic_0001>

<bundles_post_ra>
// kernel: tpu_custom_call.1
= control target key start
LH: loop header
LB: loop body
LE: loop exit
PB: predicated region body
PF: predicated region fallthrough
CT: control target
= control target key end

     0   :  { %9 = vsyncpa [#allocation3], 0  ;;  %s770_s0 = inlined_call_operand.vmem [shape: f32[2,4,130], index: 0, kind: input, shape index: {}]   ;;  %s771_s1 = inlined_call_operand.vmem [shape: f32[2,1,4,2], index: 1, kind: input, shape index: {}]   ;;  %s772_s2 = inlined_call_operand.vmem [shape: f32[3,8,4], index: 2, kind: input, shape index: {}]   ;;  %s773_s3 = inlined_call_operand.vmem [shape: f32[8,1], index: 3, kind: input, shape index: {}]   ;;  %s774_s4 = inlined_call_operand.hbm [shape: f32[2,8,128], index: 4, kind: output, shape index: {}]  }
   0x1   :  { %11 = vsyncpa [#allocation3 + $0x1], 0  ;;  %s652_s15 = smov 0   ;;  %s654_s16 = smov 0  }
   0x2   :  { %s656_s17 = smov 0   ;;  %s658_s18 = smov 0  }
   0x3   :  { %s660_s19 = smov 0   ;;  %s662_s20 = smov 0  }
   0x4 LB: > { %s462_s21 = sadd.s32 4294967295, %s622_s20   ;;  %s463_s22 = sadd.s32 4294967294, %s622_s20   ;;  %s622_s20 = sphi %s662_s20, %s17_s20   ;;  %s618_s19 = sphi %s660_s19, %s781_s19   ;;  %s614_s18 = sphi %s658_s18, %s780_s18   ;;  %s610_s17 = sphi %s656_s17, %s779_s17   ;;  %s606_s16 = sphi %s654_s16, %s778_s16   ;;  %s602_s15 = sphi %s652_s15, %s777_s15  }
   0x5   : > { %s29_s23 = sadd.s32 1, %s618_s19  ;;  %s136_s24 = sadd.s32 1, %s610_s17 }
   0x6   : > { %p31_p0 = scmp.ge.s32.totalorder %s29_s23, 2  ;;  %p146_p1 = scmp.ne.s32.totalorder %s610_s17, %s606_s16 }
   0x7   : > { %p147_p2 = scmp.eq.s32.totalorder %s462_s21, 1  ;;  %p152_p3 = scmp.ne.s32.totalorder %s606_s16, %s602_s15 }
   0x8   : > { %s783_s23 = smov (%p31_p0, %s29_s23), 0  ;;  %p153_p5 = scmp.eq.s32.totalorder %s463_s22, 1 }
   0x9   : > { %p692_p4 = por %p147_p2, %p146_p1  ;;  %s131_s26 = ssub.s32 %s618_s19, %s783_s23 }
   0xa   : > { %p466_p6 = scmp.ge.s32.totalorder %s622_s20, 1  ;;  %p134_p7 = scmp.eq.s32.totalorder %s131_s26, 0 }
   0xb   : > { %p699_p8 = por %p153_p5, %p152_p3  ;;  %p198_p9 = scmp.lt.s32.totalorder %s622_s20, 3 }
   0xc   : > { %s705_s28 = scalar_select %p134_p7, %s610_s17, %s136_s24  }
   0xd   : > { %p199_p10 = pnand %p466_p6, %p198_p9 }
   0xe   : > { %p234_p11 = scmp.lt.s32.totalorder (!%p199_p10), %s614_s18, 1  ;;  %s624_s9 = smov (!%p199_p10), 127  }
   0xf   : > { %202 = sbr.rel (%p199_p10) target bundleno = 289 (0x121), region = 36  ;;  %s625_s10 = smov (!%p199_p10), 126  }
  0x10   : > { %s231_s6 = sand.u32 (!%p199_p10), 1, %s606_s16  }
  0x11   : > { %s357_s21 = scalar_lea.sflag (!%p199_p10), [#allocation3], %s231_s6 }
  0x14   : > { %s235_s29 = scalar_select %p234_p11, %s614_s18, 1  ;;  %vm266_vm0 = vcmask 1043456   ;;  %vm262_vm1 = vcmask 31744   ;;  %v251_v2 = vld [vmem:[%s772_s2] sm:$0xff]  ;;  %v626_v4 = vmov 0   ;;  %vm260_vm2 = vcmask 1039360  }
  0x15   : > { %v348_v3 = vld [vmem:[%s773_s3] sm:$0xff]  ;;  %542 = vset.pattern.permute.xlu2 %v626_v4  ;;  %543 = vset.pattern.permute.xlu0 %v626_v4  ;;  %vm320_vm3 = vcmask 1031168   ;;  %v476_v9 = vld [vmem:[%s772_s2 + $0x10] sm:$0xff]  ;;  %v471_v10 = vld [vmem:[%s772_s2 + $0x8] sm:$0xff] }
  0x16   : > { %s483_s30 = sshll.u32 %s235_s29, 3  ;;  %s470_s8 = sshll.u32 %s235_s29, 2  ;;  %351 = vperm.xlu2 %542, %v348_v3  }
  0x17   : > { %s241_s7 = scalar_lea.vmem %s770_s0, %s483_s30  ;;  %s248_s13 = scalar_lea.vmem %s771_s1, %s470_s8 }
  0x18   : > { %v249_v0 = vld [vmem:[%s241_s7] sm:$0xf]  ;;  %s467_s7 = sshll.u32 %s231_s6, 3  ;;  %s480_s8 = sshll.u32 %s614_s18, 3 }
  0x19   : > { %256 = vrot.lane.b32.xlu1 %v249_v0, %s624_s9  ;;  %316 = vrot.lane.b32.xlu0 %v249_v0, %s625_s10  ;;  %v250_v1 = vld [vmem:[%s248_s13] sm:$0xf]  ;;  %s368_s11 = scalar_lea.hbm %s774_s4, %s480_s8  ;;  %s233_s12 = scalar_lea.vmem [#allocation2], %s467_s7 }
  0x1a   : > { %474 = vmatpush.msk.msra.mxu1 %vm266_vm0, %v249_v0  ;;  %s370_s13 = sshll.u32 %s233_s12, 4  ;;  %s372_s14 = sshll.u32 %s368_s11, 4  ;;  %s371_s13 = int_to_ptr.vmem [resolvable:$true] %s370_s13  ;;  %s373_s14 = int_to_ptr.hbm [resolvable:$true] %s372_s14 }
  0x1b   : > { %475 = vmatmul.msk.f32.vlgmr.msra.gmra.mxu1 %vm262_vm1, %v251_v2  ;;  %s558_s22 = sshra.s32 %s373_s14, 4  ;;  %s564_s29 = scalar_lea.hbm %s774_s4, 16  ;;  %s559_s22 = int_to_ptr.hbm [resolvable:$true] %s558_s22 }
  0x1c   : > { %s560_s18 = scalar_lea.hbm %s559_s22, 8  ;;  %p565_p1 = scmp.lt.s32.totalorder %s559_s22, %s774_s4 }
  0x1d   : > { %p561_p12 = scmp.ne.s32.totalorder %s559_s22, %s560_s18  ;;  %p566_p2 = scmp.lt.s32.totalorder %s564_s29, %s560_s18 }
  0x1f   : > { %p562_p13 = pnand %p561_p12, %p692_p4  ;;  %p567_p3 = por %p566_p2, %p565_p1 }
  0x21   : > { %258 = vrot.lane.b32.xlu1 %v250_v1, %s624_s9  ;;  %318 = vrot.lane.b32.xlu0 %v250_v1, %s625_s10  ;;  %p563_p0 = pneg %p562_p13 }
  0x23   : > { %p568_p5 = pnand %p567_p3, %p563_p0 }
  0x70   : > { %v352_v17 = vpop.permute.xlu2 %351 }
  0x8b   : > { %v257_v5 = vpop.permute.xlu1 %256  ;;  %v317_v6 = vpop.permute.xlu0 %316 }
  0x93   : > { %v259_v7 = vpop.permute.xlu1 %258  ;;  %v319_v8 = vpop.permute.xlu0 %318 }
  0x94   : > { %v261_v11 = vsel %vm260_vm2, %v257_v5, %v259_v7  ;;  %v321_v12 = vsel %vm320_vm3, %v317_v6, %v319_v8 }
  0x95   : > { %472 = vmatpush.msk.msra.mxu0 %vm266_vm0, %v261_v11  ;;  %477 = vmatpush.msk.msra.mxu2 %vm266_vm0, %v321_v12 }
  0x96   : > { %478 = vmatmul.msk.f32.vlgmr.msra.gmra.mxu2 %vm262_vm1, %v476_v9  ;;  %473 = vmatmul.msk.f32.vlgmr.msra.gmra.mxu0 %vm262_vm1, %v471_v10 }
  0x98   : > { %v311_v14 = vpop.f32.mrf.mxu1 }
 0x113   : > { %v286_v13 = vpop.f32.mrf.mxu0 }
 0x114   : > { %v312_v15 = vadd.f32 %v311_v14, %v286_v13 }
 0x119   : > { %v344_v16 = vpop.f32.mrf.mxu2 }
 0x11a   : > { %v347_v18 = vadd.f32 %v344_v16, %v312_v15 }
 0x11c   : > { %v354_v19 = vadd.f32 %v352_v17, %v347_v18 }
 0x11e   : > { %355 = vst [vmem:[%s233_s12] sm:$0xff] %v354_v19 }
 0x11f   : > { %571 = shalt.err (!%p568_p5)
}
 0x120   : > { %484 = dma.vmem_to_hbm [thread:$0]  (%p692_p4), %s371_s13, 128, %s373_s14, %s357_s21  }
 0x121 PF: > { %p490_p6 = scmp.ge.s32.totalorder %s622_s20, 2  ;;  %s384_s6 = sand.u32 1, %s602_s15  }
 0x122   : > { %s385_s7 = scalar_lea.sflag [#allocation3], %s384_s6 }
 0x123   : > { %p487_p7 = pnand %p490_p6, %p699_p8 }
 0x125   : > { %p488_p9 = pneg %p487_p7 }
 0x127   : > { %597 = dma.done.wait (%p488_p9), %s385_s7, 128  }
 0x128   : > { %599 = vsyncadd (%p488_p9), %s385_s7, 4294967168  ;;  %s17_s20 = sadd.s32 1, %s622_s20   ;;  %s777_s15 = smov %s606_s16 }
 0x129   : > { %p14_p10 = scmp.ge.s32.totalorder %s17_s20, 4   ;;  %s778_s16 = smov %s610_s17 }
 0x12a   : > { %s779_s17 = smov %s705_s28  ;;  %s780_s18 = smov %s618_s19 }
 0x12b   : > { %s781_s19 = smov %s783_s23  ;;  %16 = sbr.rel (!%p14_p10) target bundleno = 4 (0x4), region = 76 }
 0x130   :  { %391 = vsyncpa [#allocation3], 1 }
 0x131   :  { %393 = vsyncpa [#allocation3 + $0x1], 1 }

</bundles_post_ra>
